<compile_context>
chip_gen: v7x
topology: tpu7x:2x2x1
jax: 0.10.0
libtpu: 0.0.40
codegen_flags: <defaults>
</compile_context>

<pallas_src>
import functools
import math

import jax
import jax.numpy as jnp
from jax.experimental import pallas as pl
from jax.experimental.pallas import tpu as pltpu


def _round_up(x, m):
    return (x + m - 1) // m * m


def _vmem_capacity_bytes():
    try:
        info = pltpu.get_tpu_info()
        cap = getattr(info, "vmem_capacity_bytes", None)
        if cap:
            return int(cap)
    except Exception:
        pass
    return 64 * 1024 * 1024          # conservative: v7x per-TensorCore VMEM


_VMEM_CAP = _vmem_capacity_bytes()
_VMEM_LIMIT = int(_VMEM_CAP * 0.7)   # generation-aware scoped-VMEM budget
_BIG_VMEM = _VMEM_CAP >= 96 * 1024 * 1024   # 128-MiB parts (v5e/v6e) vs v7x


# --------------------------- Tiled linear kernel --------------------------- #
def _linear_kernel(x_ref, w_ref, b_ref, o_ref, acc_ref):
    @pl.when(pl.program_id(2) == 0)
    def _init():
        acc_ref[...] = jnp.zeros_like(acc_ref)

    acc_ref[...] += jnp.dot(x_ref[...], w_ref[...],
                            preferred_element_type=jnp.float32)

    @pl.when(pl.program_id(2) == pl.num_programs(2) - 1)
    def _finish():
        o_ref[...] = (acc_ref[...] + b_ref[...]).astype(o_ref.dtype)


def pallas_linear(x, w, b, *, out_dtype=jnp.float32, tm=256, tn=512, tk=None):
    """y = x @ w + b ; x:[M,K] bf16, w:[K,N] bf16, b:[N] f32 -> [M,N]."""
    if tk is None:
        tk = 1024 if _BIG_VMEM else 512          # bigger K tiles on 128-MiB parts
    M, K = x.shape
    K2, N = w.shape
    assert K == K2
    # bf16 sublane tile is (16,128): align M to 16, K/N to 128; pad operands to
    # a tile multiple (zeros contribute nothing) instead of falling back to a
    # single whole-array block.
    tm = min(tm, _round_up(M, 16))
    tk = min(tk, _round_up(K, 128))
    tn = min(tn, _round_up(N, 128))
    Mp, Kp, Np = _round_up(M, tm), _round_up(K, tk), _round_up(N, tn)
    if (Mp, Kp) != (M, K):
        x = jnp.pad(x, ((0, Mp - M), (0, Kp - K)))
    if (Kp, Np) != (K, N):
        w = jnp.pad(w, ((0, Kp - K), (0, Np - N)))
    if Np != N:
        b = jnp.pad(b, (0, Np - N))
    grid = (Mp // tm, Np // tn, Kp // tk)
    out = pl.pallas_call(
        _linear_kernel,
        out_shape=jax.ShapeDtypeStruct((Mp, Np), out_dtype),
        grid=grid,
        in_specs=[
            pl.BlockSpec((tm, tk), lambda i, j, k: (i, k)),
            pl.BlockSpec((tk, tn), lambda i, j, k: (k, j)),
            pl.BlockSpec((1, tn), lambda i, j, k: (0, j)),
        ],
        out_specs=pl.BlockSpec((tm, tn), lambda i, j, k: (i, j)),
        scratch_shapes=[pltpu.VMEM((tm, tn), jnp.float32)],
        compiler_params=pltpu.CompilerParams(
            dimension_semantics=("parallel", "parallel", "arbitrary"),
            vmem_limit_bytes=_VMEM_LIMIT),
    )(x, w, b.reshape(1, Np).astype(jnp.float32))
    if (Mp, Np) != (M, N):
        out = out[:M, :N]
    return out


# ------- Fused Q-projection + scores + masked softmax + sum-over-L --------- #
# Grid = (B, H); per grid step only one head's wq/k/bq slice is resident.
def _scores_kernel(x_ref, wq_ref, bq_ref, k_ref, tmps_ref, *, s_valid, scale):
    # x_ref:(1,L,D) bf16  wq_ref:(1,D,E) bf16  bq_ref:(1,1,E) f32
    # k_ref:(1,s_pad,E) bf16  tmps_ref:(1,H,s_pad) f32 (resident across h)
    h = pl.program_id(1)
    x = x_ref[0]                                                   # (L, D)
    q = (jnp.dot(x, wq_ref[0], preferred_element_type=jnp.float32)
         + bq_ref[0]) * scale                                      # (L, E) f32
    qh = q.astype(jnp.bfloat16)
    kh = k_ref[0]                                                  # (s_pad, E)
    s = jax.lax.dot_general(qh, kh, (((1,), (1,)), ((), ())),
                            preferred_element_type=jnp.float32)    # (L, s_pad)
    L, s_pad = s.shape
    if s_valid < s_pad:                                            # mask padded cols
        col = jax.lax.broadcasted_iota(jnp.int32, (L, s_pad), 1)
        s = jnp.where(col < s_valid, s, -jnp.inf)
    m = jnp.max(s, axis=-1, keepdims=True)
    p = jnp.exp(s - m)
    denom = jnp.sum(p, axis=-1, keepdims=True)
    a = p * pl.reciprocal(denom, approx=True)                      # softmax over S
    tmps_ref[0, pl.ds(h, 1), :] = jnp.sum(a, axis=0, keepdims=True)  # sum over L


def pallas_scores_tmps(target_bf16, wq3_bf16, bq3, k3_bf16, *, s_valid, scale):
    B, L, D = target_bf16.shape
    H, s_pad, E = k3_bf16.shape
    return pl.pallas_call(
        functools.partial(_scores_kernel, s_valid=s_valid, scale=scale),
        out_shape=jax.ShapeDtypeStruct((B, H, s_pad), jnp.float32),
        grid=(B, H),
        in_specs=[
            pl.BlockSpec((1, L, D), lambda b, h: (b, 0, 0)),       # reused across h
            pl.BlockSpec((1, D, E), lambda b, h: (h, 0, 0)),       # per-head wq
            pl.BlockSpec((1, 1, E), lambda b, h: (h, 0, 0)),       # per-head bq
            pl.BlockSpec((1, s_pad, E), lambda b, h: (h, 0, 0)),   # per-head k
        ],
        out_specs=pl.BlockSpec((1, H, s_pad), lambda b, h: (b, 0, 0)),
        compiler_params=pltpu.CompilerParams(
            dimension_semantics=("parallel", "arbitrary"),
            vmem_limit_bytes=_VMEM_LIMIT),
    )(target_bf16, wq3_bf16, bq3, k3_bf16)


# --------------- One-hot MXU gather of the top-k prototypes ---------------- #
def _gather_kernel(idx_ref, k3_ref, tok_ref, *, n_heads):
    # idx_ref:(1,topk,H) int32  k3_ref:(H,s_pad,E) bf16  tok_ref:(1,topk,H*E) bf16
    idx = idx_ref[0]                                               # (topk, H)
    topk = idx.shape[0]
    s_pad, E = k3_ref.shape[1], k3_ref.shape[2]
    col = jax.lax.broadcasted_iota(jnp.int32, (topk, s_pad), 1)
    for h in range(n_heads):
        onehot = (col == idx[:, h:h + 1]).astype(jnp.bfloat16)     # broadcast compare
        g = jnp.dot(onehot, k3_ref[h],
                    preferred_element_type=jnp.float32)            # exact row gather
        tok_ref[0, :, h * E:(h + 1) * E] = g.astype(tok_ref.dtype)


def pallas_gather_tokens(idxs_tkh, k3_bf16):
    B, topk, H = idxs_tkh.shape
    _, s_pad, E = k3_bf16.shape
    return pl.pallas_call(
        functools.partial(_gather_kernel, n_heads=H),
        out_shape=jax.ShapeDtypeStruct((B, topk, H * E), jnp.bfloat16),
        grid=(B,),
        in_specs=[
            pl.BlockSpec((1, topk, H), lambda b: (b, 0, 0)),
            pl.BlockSpec((H, s_pad, E), lambda b: (0, 0, 0)),      # constant -> no refetch
        ],
        out_specs=pl.BlockSpec((1, topk, H * E), lambda b: (b, 0, 0)),
        compiler_params=pltpu.CompilerParams(
            dimension_semantics=("parallel",),
            vmem_limit_bytes=_VMEM_LIMIT),
    )(idxs_tkh, k3_bf16)


# ------------------------------- Full forward ------------------------------ #
def init_params(key, d_model, n_heads, scale=0.2):
    d_keys = d_model // n_heads
    ks = jax.random.split(key, 6)
    return {
        "n_heads": n_heads,
        # PyTorch Linear stores weight as [out,in]; kept pre-transposed to [in,out].
        "wq": jax.random.normal(ks[0], (d_model, d_keys * n_heads), jnp.float32) * scale,
        "bq": jax.random.normal(ks[1], (d_keys * n_heads,), jnp.float32) * scale,
        "wk": jax.random.normal(ks[2], (d_model, d_keys * n_heads), jnp.float32) * scale,
        "bk": jax.random.normal(ks[3], (d_keys * n_heads,), jnp.float32) * scale,
        "wo": jax.random.normal(ks[4], (d_keys * n_heads, d_model), jnp.float32) * scale,
        "bo": jax.random.normal(ks[5], (d_model,), jnp.float32) * scale,
    }


def reprogramming_layer_forward(params, target_embedding, source_embedding,
                                data_id=None, *, topk, return_aux=False):
    # data_id is unused by the PyTorch forward; dropout = identity (eval mode).
    B, L, d_model = target_embedding.shape
    S, _ = source_embedding.shape
    H = params["n_heads"]
    E = d_model // H
    scale = 1.0 / math.sqrt(E)
    s_pad = _round_up(max(S, 128), 128)            # lane-dense padded S
    bf16 = jnp.bfloat16

    # Per-head weight layouts (one-time wrapper-side layout plumbing).
    wq3 = params["wq"].reshape(d_model, H, E).transpose(1, 0, 2).astype(bf16)  # (H,D,E)
    bq3 = params["bq"].reshape(H, 1, E).astype(jnp.float32)
    wk = params["wk"].astype(bf16)
    wo = params["wo"].astype(bf16)

    # K projection (tiled Pallas linear) over the lane-dense padded source.
    src_pad = jnp.pad(source_embedding, ((0, s_pad - S), (0, 0))).astype(bf16)
    k = pallas_linear(src_pad, wk, params["bk"], out_dtype=bf16)   # (s_pad, H*E)
    k3 = k.reshape(s_pad, H, E).transpose(1, 0, 2)                 # (H, s_pad, E)

    # Fused per-(batch, head): Q projection + scores + masked softmax + sum over L.
    tmps = pallas_scores_tmps(target_embedding.astype(bf16), wq3, bq3, k3,
                              s_valid=S, scale=scale)              # (B, H, s_pad)

    # Top-k of attention mass over valid S columns (tiny; plain JAX glue).
    _, idxs = jax.lax.top_k(tmps[:, :, :S], topk)                  # (B, H, topk)

    # One-hot MXU gather of the selected prototypes -> token (B, topk, H*E) bf16.
    idxs_tkh = jnp.transpose(idxs, (0, 2, 1)).astype(jnp.int32)    # (B, topk, H)
    token = pallas_gather_tokens(idxs_tkh, k3)

    # Output projection over ALL B*topk rows through the tiled linear
    # (MXU sees M=B*topk, K=d_model; wo tiled over d_model -> v7x-safe VMEM).
    out = pallas_linear(token.reshape(B * topk, H * E), wo, params["bo"],
                        out_dtype=jnp.float32).reshape(B, topk, d_model)
    if return_aux:
        return out, {"tmps": tmps, "idxs": idxs}
    return out


# ---------------------------- Reference (pure JAX) -------------------------- #
def reference_forward(params, target_embedding, source_embedding, *, topk, idxs=None):
    """Pure-JAX reference mirroring the kernel's bf16-matmul / f32-accumulate path.
    If `idxs` is provided it is used for the gather, making the end-to-end check
    independent of top-k tie-order on near-equal attention masses."""
    B, L, d_model = target_embedding.shape
    S, _ = source_embedding.shape
    H = params["n_heads"]
    E = d_model // H
    scale = 1.0 / math.sqrt(E)
    bf16 = jnp.bfloat16
    wq3 = params["wq"].reshape(d_model, H, E).transpose(1, 0, 2).astype(bf16)
    wk = params["wk"].astype(bf16)
    wo = params["wo"].astype(bf16)

    x = target_embedding.astype(bf16)
    q = jnp.einsum("bld,hde->bhle", x, wq3, preferred_element_type=jnp.float32)
    q = ((q + params["bq"].reshape(1, H, 1, E)) * scale).astype(bf16)

    k = (jnp.dot(source_embedding.astype(bf16), wk,
                 preferred_element_type=jnp.float32) + params["bk"]).astype(bf16)
    kh = k.reshape(S, H, E)

    scores = jnp.einsum("bhle,she->bhls", q, kh, preferred_element_type=jnp.float32)
    A = jax.nn.softmax(scores, axis=-1)
    tmps = jnp.sum(A, axis=2)                                      # (B, H, S)
    if idxs is None:
        _, idxs = jax.lax.top_k(tmps, topk)
    t_s = jnp.transpose(kh, (1, 0, 2))                             # (H, S, E)
    token = t_s[jnp.arange(H)[None, :, None], idxs, :]             # (B, H, topk, E)
    token = token.transpose(0, 2, 1, 3).reshape(B, topk, H * E)
    out = jnp.dot(token, wo, preferred_element_type=jnp.float32) + params["bo"]
    return out, tmps


if __name__ == "__main__":
    B, L, S = 2, 8, 16
    d_model, n_heads, topk = 32, 4, 4

    key = jax.random.PRNGKey(0)
    kp, kt, ks = jax.random.split(key, 3)
    params = init_params(kp, d_model, n_heads)
    target = jax.random.normal(kt, (B, L, d_model), jnp.float32)
    source = jax.random.normal(ks, (S, d_model), jnp.float32)

    out, aux = reprogramming_layer_forward(params, target, source, data_id=None,
                                           topk=topk, return_aux=True)
    out = jax.block_until_ready(out)
    assert out.shape == (B, topk, d_model)

    # Check 1: attention-mass tensor (softmax pipeline) against pure-JAX reference.
    # Check 2: gathered + projected output using the kernel path's indices so the
    # test does not hinge on tie-order of near-equal attention masses.
    ref_out, ref_tmps = reference_forward(params, target, source, topk=topk,
                                          idxs=aux["idxs"])
    tmps_err = float(jnp.max(jnp.abs(aux["tmps"][:, :, :S] - ref_tmps)))
    out_err = float(jnp.max(jnp.abs(out - ref_out)))
    assert tmps_err < 2e-2, f"tmps mismatch: {tmps_err}"
    assert out_err < 2e-2, f"output mismatch: {out_err}"
    # Padded S columns must carry (numerically) zero attention mass.
    assert float(jnp.max(jnp.abs(aux["tmps"][:, :, S:]))) < 1e-6

    print("KERNEL_OK")
</pallas_src>

<mosaic_0001>
module attributes {stable_mosaic.version = 11 : i64} {
  func.func @_linear_kernel(%arg0: i32, %arg1: i32, %arg2: i32, %arg3: memref<128x128xbf16, #tpu.memory_space<vmem>>, %arg4: memref<128x128xbf16, #tpu.memory_space<vmem>>, %arg5: memref<1x128xf32, #tpu.memory_space<vmem>>, %arg6: memref<128x128xbf16, #tpu.memory_space<vmem>>, %arg7: memref<128x128xf32, #tpu.memory_space<vmem>>) attributes {dimension_semantics = [#tpu.dimension_semantics<parallel>, #tpu.dimension_semantics<parallel>, #tpu.dimension_semantics<arbitrary>], iteration_bounds = array<i64: 1, 1, 1>, scalar_prefetch = 0 : i64, scratch_operands = 1 : i64, tpu.core_type = #tpu.core_type<tc>, window_params = [{transform_indices = @transform_0, window_bounds = array<i64: 128, 128>}, {transform_indices = @transform_1, window_bounds = array<i64: 128, 128>}, {transform_indices = @transform_2, window_bounds = array<i64: 1, 128>}, {transform_indices = @transform_3, window_bounds = array<i64: 128, 128>}]} {
    %c0_i32 = arith.constant 0 : i32
    %0 = arith.cmpi eq, %arg2, %c0_i32 : i32
    %1 = arith.extui %0 : i1 to i32
    %c0_i32_0 = arith.constant 0 : i32
    %2 = arith.cmpi ne, %1, %c0_i32_0 : i32
    scf.if %2 {
      %cst_10 = arith.constant 0.000000e+00 : f32
      %12 = vector.broadcast %cst_10 : f32 to vector<128x128xf32>
      %c0_11 = arith.constant 0 : index
      %c0_12 = arith.constant 0 : index
      %13 = vector.load %arg7[%c0_11, %c0_12] : memref<128x128xf32, #tpu.memory_space<vmem>>, vector<128x128xf32>
      tpu.vector_store %arg7[%c0_11, %c0_12], %12 {strides = array<i32>} : memref<128x128xf32, #tpu.memory_space<vmem>>, vector<128x128xf32>,
    } else {
    }
    %c0 = arith.constant 0 : index
    %c0_1 = arith.constant 0 : index
    %3 = vector.load %arg7[%c0, %c0_1] : memref<128x128xf32, #tpu.memory_space<vmem>>, vector<128x128xf32>
    %c0_2 = arith.constant 0 : index
    %c0_3 = arith.constant 0 : index
    %4 = vector.load %arg3[%c0_2, %c0_3] : memref<128x128xbf16, #tpu.memory_space<vmem>>, vector<128x128xbf16>
    %c0_4 = arith.constant 0 : index
    %c0_5 = arith.constant 0 : index
    %5 = vector.load %arg4[%c0_4, %c0_5] : memref<128x128xbf16, #tpu.memory_space<vmem>>, vector<128x128xbf16>
    %cst = arith.constant dense<0.000000e+00> : vector<128x128xf32>
    %6 = tpu.matmul %4, %5, %cst {dimension_numbers = #tpu.dot_dimension_numbers<[1], [0], [0], [1], [0, 0, 1, 1], [], []>} : vector<128x128xbf16>, vector<128x128xbf16>, vector<128x128xf32> -> vector<128x128xf32>
    %7 = arith.addf %3, %6 : vector<128x128xf32>
    %c0_6 = arith.constant 0 : index
    %c0_7 = arith.constant 0 : index
    %8 = vector.load %arg7[%c0_6, %c0_7] : memref<128x128xf32, #tpu.memory_space<vmem>>, vector<128x128xf32>
    tpu.vector_store %arg7[%c0_6, %c0_7], %7 {strides = array<i32>} : memref<128x128xf32, #tpu.memory_space<vmem>>, vector<128x128xf32>,
    %c0_i32_8 = arith.constant 0 : i32
    %9 = arith.cmpi eq, %arg2, %c0_i32_8 : i32
    %10 = arith.extui %9 : i1 to i32
    %c0_i32_9 = arith.constant 0 : i32
    %11 = arith.cmpi ne, %10, %c0_i32_9 : i32
    scf.if %11 {
      %c0_10 = arith.constant 0 : index
      %c0_11 = arith.constant 0 : index
      %12 = vector.load %arg7[%c0_10, %c0_11] : memref<128x128xf32, #tpu.memory_space<vmem>>, vector<128x128xf32>
      %c0_12 = arith.constant 0 : index
      %c0_13 = arith.constant 0 : index
      %13 = vector.load %arg5[%c0_12, %c0_13] : memref<1x128xf32, #tpu.memory_space<vmem>>, vector<1x128xf32>
      %14 = vector.broadcast %13 : vector<1x128xf32> to vector<128x128xf32>
      %15 = arith.addf %12, %14 : vector<128x128xf32>
      %16 = arith.truncf %15 : vector<128x128xf32> to vector<128x128xbf16>
      %c0_14 = arith.constant 0 : index
      %c0_15 = arith.constant 0 : index
      %17 = vector.load %arg6[%c0_14, %c0_15] : memref<128x128xbf16, #tpu.memory_space<vmem>>, vector<128x128xbf16>
      tpu.vector_store %arg6[%c0_14, %c0_15], %16 {strides = array<i32>} : memref<128x128xbf16, #tpu.memory_space<vmem>>, vector<128x128xbf16>,
    } else {
    }
    return
  }
  func.func @transform_0(%arg0: i32, %arg1: i32, %arg2: i32) -> (i32, i32) {
    %c0_i32 = arith.constant 0 : i32
    return %arg0, %arg2 : i32, i32
  }
  func.func @transform_1(%arg0: i32, %arg1: i32, %arg2: i32) -> (i32, i32) {
    %c0_i32 = arith.constant 0 : i32
    return %arg2, %arg1 : i32, i32
  }
  func.func @transform_2(%arg0: i32, %arg1: i32, %arg2: i32) -> (i32, i32) {
    %c0_i32 = arith.constant 0 : i32
    %c0_i32_0 = arith.constant 0 : i32
    return %c0_i32, %arg1 : i32, i32
  }
  func.func @transform_3(%arg0: i32, %arg1: i32, %arg2: i32) -> (i32, i32) {
    %c0_i32 = arith.constant 0 : i32
    return %arg0, %arg1 : i32, i32
  }
}

</mosaic_0001>

<bundles_post_ra>
// kernel: tpu_custom_call.1
= control target key start
LH: loop header
LB: loop body
LE: loop exit
PB: predicated region body
PF: predicated region fallthrough
CT: control target
= control target key end

     0   :  { %8 = vsyncpa [#allocation4], 0  ;;  %s803_s0 = inlined_call_operand.hbm [shape: bf16[128,128], index: 0, kind: input, shape index: {}]   ;;  %s804_s1 = inlined_call_operand.hbm [shape: bf16[128,128], index: 1, kind: input, shape index: {}]   ;;  %s805_s2 = inlined_call_operand.vmem [shape: f32[1,128], index: 2, kind: input, shape index: {}]   ;;  %s806_s3 = inlined_call_operand.hbm [shape: bf16[128,128], index: 3, kind: output, shape index: {}]  }
   0x1   :  { %9 = vsyncpa [#allocation7], 0 }
   0x2   :  { %10 = vsyncpa [#allocation5], 0  ;;  %s730_s12 = smov [#allocation3]   ;;  %s658_s16 = scalar_lea.hbm %s803_s0, 1024 }
   0x3   :  { %s16_s13 = sshll.u32 %s730_s12, 4  ;;  %p659_p0 = scmp.ne.s32.totalorder %s803_s0, %s658_s16  ;;  %s17_s13 = int_to_ptr.vmem [resolvable:$true] %s16_s13 }
   0x4   :  { %p662_p1 = scmp.lt.u32.totalorder %s658_s16, %s803_s0 }
   0x6   :  { %p664_p2 = pnand %p662_p1, %p659_p0 }
   0x8   :  { %667 = shalt.err (!%p664_p2)
}
   0x9   :  { %s668_s21 = scalar_lea.vmem %s17_s13, 1024  ;;  %p673_p4 = scmp.lt.s32.totalorder %s17_s13, %s17_s13 }
   0xa   :  { %p669_p3 = scmp.ne.s32.totalorder %s17_s13, %s668_s21  ;;  %p674_p5 = scmp.lt.s32.totalorder %s668_s21, %s668_s21 }
   0xc   :  { %p675_p6 = por %p674_p5, %p673_p4 }
   0xe   :  { %p676_p7 = pnand %p675_p6, %p669_p3 }
  0x10   :  { %679 = shalt.err (!%p676_p7)
}
  0x11   :  { %s731_s22 = smov 64   ;;  %s732_s23 = smov 4  }
  0x12   :  { %22 = dma.hbm_to_vmem [thread:$0]  %s803_s0, 1024, %s17_s13, [#allocation4], %s731_s22, %s731_s22, %s732_s23  }
  0x13   :  { %s733_s26 = smov [#allocation6]   ;;  %s680_s30 = scalar_lea.hbm %s804_s1, 1024 }
  0x14   :  { %s28_s27 = sshll.u32 %s733_s26, 4  ;;  %p681_p8 = scmp.ne.s32.totalorder %s804_s1, %s680_s30  ;;  %s29_s27 = int_to_ptr.vmem [resolvable:$true] %s28_s27 }
  0x15   :  { %p684_p9 = scmp.lt.u32.totalorder %s680_s30, %s804_s1 }
  0x17   :  { %p686_p10 = pnand %p684_p9, %p681_p8 }
  0x19   :  { %689 = shalt.err (!%p686_p10)
}
  0x1a   :  { %s690_s8 = scalar_lea.vmem %s29_s27, 1024  ;;  %p695_p12 = scmp.lt.s32.totalorder %s29_s27, %s29_s27 }
  0x1b   :  { %p691_p11 = scmp.ne.s32.totalorder %s29_s27, %s690_s8  ;;  %p696_p13 = scmp.lt.s32.totalorder %s690_s8, %s690_s8 }
  0x1d   :  { %p697_p0 = por %p696_p13, %p695_p12 }
  0x1f   :  { %p698_p1 = pnand %p697_p0, %p691_p11 }
  0x21   :  { %701 = shalt.err (!%p698_p1)
}
  0x22   :  { %34 = dma.hbm_to_vmem [thread:$0]  %s804_s1, 1024, %s29_s27, [#allocation7], %s731_s22, %s731_s22, %s732_s23  }
  0x23   :  { %724 = dma.done.wait [#allocation4], 1024  }
  0x24   :  { %725 = vsyncadd [#allocation4], 4294966272 }
  0x25   :  { %726 = dma.done.wait [#allocation7], 1024  }
  0x26   :  { %727 = vsyncadd [#allocation7], 4294966272  ;;  %v642_v0 = vld [vmem:[#allocation6] sm:$0xff]   ;;  %v643_v1 = vld [vmem:[#allocation6 + $0x8] sm:$0xff]  }
  0x27   :  { %589 = vmatprep.subr.bf16.mxu0 %v642_v0  ;;  %621 = vmatprep.subr.bf16.mxu1 %v642_v0  ;;  %v644_v2 = vld [vmem:[#allocation6 + $0x10] sm:$0xff]   ;;  %v645_v3 = vld [vmem:[#allocation6 + $0x18] sm:$0xff]   ;;  %v650_v4 = vld [vmem:[#allocation3] sm:$0xff]  }
  0x28   :  { %590 = vmatpush3.bf16.msra.mxu0 %v642_v0  ;;  %629 = vmatpush3.bf16.msra.mxu1 %v642_v0  ;;  %v651_v5 = vld [vmem:[#allocation3 + $0x20] sm:$0xff]   ;;  %v647_v7 = vld [vmem:[#allocation6 + $0x28] sm:$0xff]   ;;  %v648_v8 = vld [vmem:[#allocation6 + $0x30] sm:$0xff]  }
  0x29   :  { %591 = vmatprep.subr.bf16.mxu0 %v643_v1  ;;  %622 = vmatprep.subr.bf16.mxu1 %v643_v1  ;;  %v646_v6 = vld [vmem:[#allocation6 + $0x20] sm:$0xff]   ;;  %v649_v9 = vld [vmem:[#allocation6 + $0x38] sm:$0xff]   ;;  %v652_v10 = vld [vmem:[#allocation3 + $0x8] sm:$0xff]  }
  0x2a   :  { %605 = vmatprep.mubr.bf16.mxu0 %v650_v4  ;;  %613 = vmatprep.mubr.bf16.mxu1 %v651_v5  ;;  %v653_v11 = vld [vmem:[#allocation3 + $0x28] sm:$0xff]   ;;  %v654_v12 = vld [vmem:[#allocation3 + $0x10] sm:$0xff]   ;;  %v656_v14 = vld [vmem:[#allocation3 + $0x18] sm:$0xff]  }
  0x2b   :  { %v655_v13 = vld [vmem:[#allocation3 + $0x30] sm:$0xff]   ;;  %v657_v15 = vld [vmem:[#allocation3 + $0x38] sm:$0xff]   ;;  %v493_v17 = vld [vmem:[%s805_s2] ss:$0 sm:$0xff]  ;;  %s734_s2 = smov [#allocation8]  }
  0x2c   :  { %592 = vmatpush3.bf16.msra.mxu0 %v643_v1  ;;  %630 = vmatpush3.bf16.msra.mxu1 %v643_v1  ;;  %s464_s11 = sshll.u32 %s734_s2, 4  ;;  %s465_s11 = int_to_ptr.vmem [resolvable:$true] %s464_s11 }
  0x2d   :  { %593 = vmatprep.subr.bf16.mxu0 %v644_v2  ;;  %623 = vmatprep.subr.bf16.mxu1 %v644_v2  ;;  %s702_s12 = scalar_lea.vmem %s465_s11, 1024  ;;  %p707_p3 = scmp.lt.s32.totalorder %s465_s11, %s465_s11 }
  0x2e   :  { %p703_p2 = scmp.ne.s32.totalorder %s465_s11, %s702_s12  ;;  %p708_p4 = scmp.lt.s32.totalorder %s702_s12, %s702_s12 }
  0x30   :  { %594 = vmatpush3.bf16.msra.mxu0 %v644_v2  ;;  %631 = vmatpush3.bf16.msra.mxu1 %v644_v2  ;;  %p709_p5 = por %p708_p4, %p707_p3 }
  0x31   :  { %595 = vmatprep.subr.bf16.mxu0 %v645_v3  ;;  %624 = vmatprep.subr.bf16.mxu1 %v645_v3 }
  0x32   :  { %p710_p6 = pnand %p709_p5, %p703_p2 }
  0x34   :  { %596 = vmatpush3.bf16.msra.mxu0 %v645_v3  ;;  %632 = vmatpush3.bf16.msra.mxu1 %v645_v3 }
  0x35   :  { %597 = vmatprep.subr.bf16.mxu0 %v646_v6  ;;  %625 = vmatprep.subr.bf16.mxu1 %v646_v6 }
  0x38   :  { %598 = vmatpush3.bf16.msra.mxu0 %v646_v6  ;;  %633 = vmatpush3.bf16.msra.mxu1 %v646_v6 }
  0x39   :  { %599 = vmatprep.subr.bf16.mxu0 %v647_v7  ;;  %626 = vmatprep.subr.bf16.mxu1 %v647_v7 }
  0x3c   :  { %600 = vmatpush3.bf16.msra.mxu0 %v647_v7  ;;  %634 = vmatpush3.bf16.msra.mxu1 %v647_v7 }
  0x3d   :  { %601 = vmatprep.subr.bf16.mxu0 %v648_v8  ;;  %627 = vmatprep.subr.bf16.mxu1 %v648_v8 }
  0x40   :  { %602 = vmatpush3.bf16.msra.mxu0 %v648_v8  ;;  %635 = vmatpush3.bf16.msra.mxu1 %v648_v8 }
  0x41   :  { %603 = vmatprep.subr.bf16.mxu0 %v649_v9  ;;  %628 = vmatprep.subr.bf16.mxu1 %v649_v9 }
  0x44   :  { %604 = vmatpush3.bf16.msra.mxu0 %v649_v9  ;;  %636 = vmatpush3.bf16.msra.mxu1 %v649_v9 }
  0x47   :  { %606 = vmatmul.mubr.bf16.vlgmr.msra.gmra.mrb[0].mxu0 %v652_v10  ;;  %614 = vmatmul.mubr.bf16.vlgmr.msra.gmra.mrb[0].mxu1 %v653_v11 }
  0x48   :  { %609 = vmatprep.mubr.bf16.mxu0 %v654_v12  ;;  %617 = vmatprep.mubr.bf16.mxu1 %v655_v13 }
  0x4f   :  { %610 = vmatmul.mubr.bf16.gmra.mrb[4].mxu0 %v656_v14  ;;  %618 = vmatmul.mubr.bf16.gmra.mrb[4].mxu1 %v657_v15 }
 0x11a   :  { %v607_v16 = vpop.f32.mrb[0].mxu0  ;;  %v615_v18 = vpop.f32.mrb[0].mxu1 }
 0x11b   :  { %v242_v19 = vpop.f32.mrb[1].mxu0  ;;  %v274_v20 = vpop.f32.mrb[1].mxu1  ;;  %v365_v23 = vadd.f32 %v607_v16, %v493_v17  ;;  %v373_v24 = vadd.f32 %v615_v18, %v493_v17 }
 0x11c   :  { %v608_v21 = vpop.f32.mrb[2].mxu0  ;;  %v616_v22 = vpop.f32.mrb[2].mxu1  ;;  %v363_v29 = vadd.f32 %v493_v17, %v242_v19  ;;  %v371_v30 = vadd.f32 %v493_v17, %v274_v20 }
 0x11d   :  { %v366_v25 = vadd.f32 %v608_v21, %v493_v17  ;;  %v374_v26 = vadd.f32 %v616_v22, %v493_v17  ;;  %v245_v27 = vpop.f32.mrb[3].mxu0  ;;  %v277_v28 = vpop.f32.mrb[3].mxu1 }
 0x11e   :  { %v364_v31 = vadd.f32 %v493_v17, %v245_v27  ;;  %v372_v32 = vadd.f32 %v493_v17, %v277_v28 }
 0x11f   :  { %v534_v33 = vpack.c.bf16 %v366_v25, %v365_v23  ;;  %v554_v34 = vpack.c.bf16 %v374_v26, %v373_v24 }
 0x120   :  { %v529_v35 = vpack.c.bf16 %v364_v31, %v363_v29  ;;  %v549_v36 = vpack.c.bf16 %v372_v32, %v371_v30 }
 0x121   :  { %566 = vst [vmem:[#allocation8 + $0x8] sm:$0xff] %v534_v33   ;;  %570 = vst [vmem:[#allocation8 + $0x28] sm:$0xff] %v554_v34  }
 0x122   :  { %530 = vst [vmem:[#allocation8] sm:$0xff] %v529_v35   ;;  %569 = vst [vmem:[#allocation8 + $0x20] sm:$0xff] %v549_v36   ;;  %v611_v37 = vpop.f32.mrb[4].mxu0  ;;  %v619_v38 = vpop.f32.mrb[4].mxu1 }
 0x123   :  { %v258_v39 = vpop.f32.mrb[5].mxu0  ;;  %v290_v40 = vpop.f32.mrb[5].mxu1  ;;  %v369_v43 = vadd.f32 %v611_v37, %v493_v17  ;;  %v377_v44 = vadd.f32 %v619_v38, %v493_v17 }
 0x124   :  { %v612_v41 = vpop.f32.mrb[6].mxu0  ;;  %v620_v42 = vpop.f32.mrb[6].mxu1  ;;  %v367_v49 = vadd.f32 %v493_v17, %v258_v39  ;;  %v375_v50 = vadd.f32 %v493_v17, %v290_v40 }
 0x125   :  { %v370_v45 = vadd.f32 %v612_v41, %v493_v17  ;;  %v378_v46 = vadd.f32 %v620_v42, %v493_v17  ;;  %v261_v47 = vpop.f32.mrb[7].mxu0  ;;  %v293_v48 = vpop.f32.mrb[7].mxu1 }
 0x126   :  { %v368_v51 = vadd.f32 %v493_v17, %v261_v47  ;;  %v376_v52 = vadd.f32 %v493_v17, %v293_v48 }
 0x127   :  { %v544_v53 = vpack.c.bf16 %v370_v45, %v369_v43  ;;  %v564_v54 = vpack.c.bf16 %v378_v46, %v377_v44 }
 0x128   :  { %v539_v55 = vpack.c.bf16 %v368_v51, %v367_v49  ;;  %v559_v56 = vpack.c.bf16 %v376_v52, %v375_v50 }
 0x129   :  { %568 = vst [vmem:[#allocation8 + $0x18] sm:$0xff] %v544_v53   ;;  %572 = vst [vmem:[#allocation8 + $0x38] sm:$0xff] %v564_v54  }
 0x12a   :  { %567 = vst [vmem:[#allocation8 + $0x10] sm:$0xff] %v539_v55   ;;  %571 = vst [vmem:[#allocation8 + $0x30] sm:$0xff] %v559_v56  }
 0x12b   :  { %713 = shalt.err (!%p710_p6)
}
 0x12c   :  { %s714_s15 = scalar_lea.hbm %s806_s3, 1024 }
 0x12d   :  { %p715_p7 = scmp.ne.s32.totalorder %s806_s3, %s714_s15  ;;  %p718_p8 = scmp.lt.u32.totalorder %s714_s15, %s806_s3 }
 0x12f   :  { %p720_p9 = pnand %p718_p8, %p715_p7 }
 0x131   :  { %723 = shalt.err (!%p720_p9)
}
 0x132   :  { %470 = dma.vmem_to_hbm [thread:$0]  %s465_s11, 1024, %s806_s3, [#allocation5], %s731_s22, %s731_s22, %s732_s23  }
 0x133   :  { %728 = dma.done.wait [#allocation5], 1024  }
 0x134   :  { %729 = vsyncadd [#allocation5], 4294966272 }
 0x135   :  { %474 = vsyncpa [#allocation4], 1 }
 0x136   :  { %475 = vsyncpa [#allocation7], 1 }
 0x137   :  { %476 = vsyncpa [#allocation5], 1 }

</bundles_post_ra>
